<compile_context>
chip_gen: v6e
topology: v6e:2x2x1
jax: 0.10.0
libtpu: 0.0.40
codegen_flags: <defaults>
</compile_context>

<pallas_src>
import jax
import jax.numpy as jnp
from jax import lax
from jax.experimental import pallas as pl
from jax.experimental.pallas import tpu as pltpu


TRAJ_LEN = 1000     # traj_length: forward applies Linear(1000, 2) to x[..., 0]
TRANSITION = 4      # transition / d_model; only channel 0 is consumed
N_OUT = 2

_SMALL_BATCH_MAX = 64              # <= this: single-shot, no grid / pipeline machinery
_TILE_B = 512                      # max rows per batch tile (8 MiB of f32 x per tile)
_VMEM_LIMIT = 32 * 1024 * 1024     # ~2x the ~16.1 MiB a TB=512 double-buffered step needs;
                                   # needed on v5e (16 MiB default), safe on v7x (64 MiB phys)


# ---------------------------------------------------------------------------
# Kernel (shared by the no-grid and the batch-tiled paths)
# ---------------------------------------------------------------------------

def _linear_kernel(x_ref, w_ref, b_ref, o_ref):
    """y = x @ W^T + b on one tile of rows.

    x_ref: [TB, Kf] VMEM   flattened rows (channel-0 slice folded into W)
    w_ref: [N,  Kf] VMEM   lane-dense weight rows, resident across tiles
    b_ref: [1,  N ] VMEM   bias, resident across tiles
    o_ref: [TB, N ] VMEM
    """
    acc = lax.dot_general(
        x_ref[...], w_ref[...],
        # contract dim 1 of both operands: the [N, Kf] weight is consumed directly
        dimension_numbers=(((1,), (1,)), ((), ())),
        preferred_element_type=jnp.float32,
    )                                                   # [TB, N]
    o_ref[...] = (acc + b_ref[...]).astype(o_ref.dtype)


# ---------------------------------------------------------------------------
# Parameters
# ---------------------------------------------------------------------------

def init_params(key):
    """Parameters of the only layer exercised by forward: nn.Linear(TRAJ_LEN, N_OUT)."""
    kw, kb = jax.random.split(key)
    bound = 1.0 / jnp.sqrt(float(TRAJ_LEN))
    w = jax.random.uniform(kw, (N_OUT, TRAJ_LEN), jnp.float32, -bound, bound)  # torch layout
    b = jax.random.uniform(kb, (N_OUT,), jnp.float32, -bound, bound)
    return {"other_layer_w": w, "other_layer_b": b}


def prepare_params(params, transition=TRANSITION):
    """One-time prep: fold the x[..., 0] slice into the weight and store it
    lane-dense as [N, T*C], so per-call there is no transpose and no strided
    gather of x."""
    w = params["other_layer_w"]                                    # [N, T]
    n_out, t = w.shape
    w_eff = jnp.zeros((n_out, t, transition), w.dtype).at[:, :, 0].set(w)
    return {"w_eff": w_eff.reshape(n_out, t * transition),         # [N, T*C]
            "b": params["other_layer_b"].reshape(1, n_out)}        # [1, N]


# ---------------------------------------------------------------------------
# Forward wrapper
# ---------------------------------------------------------------------------

def _pick_batch_tile(batch):
    """At least 2 grid steps (DMA/compute overlap + v7x 2-TC sharding), capped at
    _TILE_B rows, multiple of 8 sublanes."""
    half = -(-batch // 2)                      # cdiv(batch, 2)
    tb = ((half + 7) // 8) * 8
    return max(8, min(_TILE_B, tb))


@jax.jit
def temporal_unet_forward(x, time, prepared, cond_traj=None, cond=None):
    """x: [batch, traj_length, transition]."""
    del time, cond_traj, cond                  # unused by the exercised forward path
    w_eff = prepared["w_eff"]                  # [N, Kf]
    b = prepared["b"]                          # [1, N]
    n_out, kf = w_eff.shape
    batch = x.shape[0]
    assert x.shape[1] * x.shape[2] == kf, "weight was prepared for a different x layout"

    x_flat = x.reshape(batch, kf)              # contiguous reshape: no data movement

    if batch <= _SMALL_BATCH_MAX:
        # Truly tiny workload (< 1 MiB of x): single invocation, all operands
        # resident in VMEM, no pipeline machinery.
        return pl.pallas_call(
            _linear_kernel,
            out_shape=jax.ShapeDtypeStruct((batch, n_out), jnp.float32),
            in_specs=[
                pl.BlockSpec(memory_space=pltpu.MemorySpace.VMEM),
                pl.BlockSpec(memory_space=pltpu.MemorySpace.VMEM),
                pl.BlockSpec(memory_space=pltpu.MemorySpace.VMEM),
            ],
            out_specs=pl.BlockSpec(memory_space=pltpu.MemorySpace.VMEM),
        )(x_flat, w_eff, b)

    # Batch-tiled path: cdiv grid handles the ragged last tile (no jnp.pad copy),
    # weight/bias stay resident across tiles, tiles shard across cores.
    tb = _pick_batch_tile(batch)
    grid = (pl.cdiv(batch, tb),)

    return pl.pallas_call(
        _linear_kernel,
        out_shape=jax.ShapeDtypeStruct((batch, n_out), jnp.float32),
        grid_spec=pltpu.PrefetchScalarGridSpec(
            num_scalar_prefetch=0,
            grid=grid,
            in_specs=[
                pl.BlockSpec((tb, kf), lambda i: (i, 0)),        # x tile (streamed)
                pl.BlockSpec((n_out, kf), lambda i: (0, 0)),     # weight, resident
                pl.BlockSpec((1, n_out), lambda i: (0, 0)),      # bias, resident
            ],
            out_specs=pl.BlockSpec((tb, n_out), lambda i: (i, 0)),
        ),
        compiler_params=pltpu.CompilerParams(
            dimension_semantics=("parallel",),
            vmem_limit_bytes=_VMEM_LIMIT,
        ),
    )(x_flat, w_eff, b)


# ---------------------------------------------------------------------------
# Demo / self-check
# ---------------------------------------------------------------------------

if __name__ == "__main__":
    key = jax.random.PRNGKey(0)
    k_params, k_x0, k_x1, k_x2 = jax.random.split(key, 4)

    params = init_params(k_params)
    prepared = prepare_params(params, TRANSITION)

    w = params["other_layer_w"]
    bias = params["other_layer_b"]

    def ref_fn(x):
        return x[..., 0] @ w.T + bias

    # Tolerance accommodates TPU default (reduced-precision pass) matmuls possibly
    # differing between the XLA reference and the MXU kernel; real bugs are O(0.1-1).
    TOL = 1e-2

    # 1) Tiny batch: single-shot (no-grid) path.
    b0 = 2
    x0 = jax.random.normal(k_x0, (b0, TRAJ_LEN, TRANSITION), jnp.float32)
    t0 = jnp.zeros((b0,), jnp.float32)
    y0 = jax.block_until_ready(temporal_unet_forward(x0, t0, prepared))
    assert y0.shape == (b0, N_OUT)
    assert jnp.allclose(y0, ref_fn(x0), atol=TOL, rtol=TOL)

    # 2) Medium batch, not tile-aligned: cdiv grid, 2 grid steps, ragged last tile.
    b1 = 200
    x1 = jax.random.normal(k_x1, (b1, TRAJ_LEN, TRANSITION), jnp.float32)
    t1 = jnp.zeros((b1,), jnp.float32)
    y1 = jax.block_until_ready(temporal_unet_forward(x1, t1, prepared))
    assert y1.shape == (b1, N_OUT)
    assert jnp.allclose(y1, ref_fn(x1), atol=TOL, rtol=TOL)

    # 3) Larger batch: TB=512 tiles, 3 grid steps, ragged last tile (no jnp.pad).
    b2 = 1040
    x2 = jax.random.normal(k_x2, (b2, TRAJ_LEN, TRANSITION), jnp.float32)
    t2 = jnp.zeros((b2,), jnp.float32)
    y2 = jax.block_until_ready(temporal_unet_forward(x2, t2, prepared))
    assert y2.shape == (b2, N_OUT)
    assert jnp.allclose(y2, ref_fn(x2), atol=TOL, rtol=TOL)

    print("KERNEL_OK")
</pallas_src>

<mosaic_0001>
module attributes {stable_mosaic.version = 11 : i64} {
  func.func @_linear_kernel(%arg0: memref<2x4000xf32, #tpu.memory_space<vmem>>, %arg1: memref<2x4000xf32, #tpu.memory_space<vmem>>, %arg2: memref<1x2xf32, #tpu.memory_space<vmem>>, %arg3: memref<2x2xf32, #tpu.memory_space<vmem>>) attributes {dimension_semantics = [], scalar_prefetch = 0 : i64, scratch_operands = 0 : i64, tpu.core_type = #tpu.core_type<tc>} {
    %c0 = arith.constant 0 : index
    %c0_0 = arith.constant 0 : index
    %0 = vector.load %arg0[%c0, %c0_0] : memref<2x4000xf32, #tpu.memory_space<vmem>>, vector<2x4000xf32>
    %c0_1 = arith.constant 0 : index
    %c0_2 = arith.constant 0 : index
    %1 = vector.load %arg1[%c0_1, %c0_2] : memref<2x4000xf32, #tpu.memory_space<vmem>>, vector<2x4000xf32>
    %cst = arith.constant dense<0.000000e+00> : vector<2x2xf32>
    %2 = tpu.matmul %0, %1, %cst {dimension_numbers = #tpu.dot_dimension_numbers<[1], [1], [0], [0], [0, 0, 1, 0], [], []>} : vector<2x4000xf32>, vector<2x4000xf32>, vector<2x2xf32> -> vector<2x2xf32>
    %c0_3 = arith.constant 0 : index
    %c0_4 = arith.constant 0 : index
    %3 = vector.load %arg2[%c0_3, %c0_4] : memref<1x2xf32, #tpu.memory_space<vmem>>, vector<1x2xf32>
    %4 = vector.broadcast %3 : vector<1x2xf32> to vector<2x2xf32>
    %5 = arith.addf %2, %4 : vector<2x2xf32>
    %c0_5 = arith.constant 0 : index
    %c0_6 = arith.constant 0 : index
    %6 = vector.load %arg3[%c0_5, %c0_6] : memref<2x2xf32, #tpu.memory_space<vmem>>, vector<2x2xf32>
    tpu.vector_store %arg3[%c0_5, %c0_6], %5 {strides = array<i32>} : memref<2x2xf32, #tpu.memory_space<vmem>>, vector<2x2xf32>,
    return
  }
}

</mosaic_0001>

<bundles_post_ra>
// kernel: temporal_unet_forward.1
= control target key start
LH: loop header
LB: loop body
LE: loop exit
PB: predicated region body
PF: predicated region fallthrough
CT: control target
= control target key end

     0   :  { %v50_v1 = vlaneseq  ;;  %v1572_v3 = vmov 1983009808   ;;  %s1682_s0 = inlined_call_operand.vmem [shape: f32[2,4000], index: 0, kind: input, shape index: {}]   ;;  %s1683_s1 = inlined_call_operand.vmem [shape: f32[2,4000], index: 1, kind: input, shape index: {}]   ;;  %s1684_s2 = inlined_call_operand.vmem [shape: f32[1,2], index: 2, kind: input, shape index: {}]   ;;  %s1685_s3 = inlined_call_operand.hbm [shape: f32[2,2], index: 3, kind: output, shape index: {}]  }
   0x1   :  { %v23_v0 = vld [vmem:[%s1683_s1] sm:$0xff]  ;;  %v48_v4 = vunpack.c.l.s4 %v1572_v3  ;;  %v24_v5 = vld [vmem:[%s1683_s1 + $0x8] sm:$0xff]  ;;  %v25_v11 = vld [vmem:[%s1683_s1 + $0x10] sm:$0xff] }
   0x2   :  { %v15_v2 = vld [vmem:[%s1682_s0] sm:$0xff]  ;;  %v16_v6 = vld [vmem:[%s1682_s0 + $0x8] sm:$0xff]  ;;  %v51_v7 = vshrl.u32 %v50_v1, 7  ;;  %v221_v9 = vcombine.high %v23_v0, %v23_v0  ;;  %v17_v12 = vld [vmem:[%s1682_s0 + $0x10] sm:$0xff]  ;;  %v238_v13 = vcombine.high %v24_v5, %v24_v5 }
   0x3   :  { %v49_v8 = vunpack.c.0.s8 %v48_v4  ;;  %v46_v10 = vcombine.high %v15_v2, %v15_v2  ;;  %v63_v14 = vcombine.high %v16_v6, %v16_v6 }
   0x5   :  { %v1612_v15 = vsub.s32 %v49_v8, %v51_v7 }
   0x6   :  { %8 = vsyncpa [#allocation3], 0  ;;  %v255_v16 = vcombine.high %v25_v11, %v25_v11  ;;  %v80_v17 = vcombine.high %v17_v12, %v17_v12  ;;  %v26_v22 = vld [vmem:[%s1683_s1 + $0x18] sm:$0xff]  ;;  %v27_v32 = vld [vmem:[%s1683_s1 + $0x20] sm:$0xff]  ;;  %vm388_vm0 = vcmask 261120   ;;  %vm1513_vm1 = vcmask 9216  }
   0x7   :  { %v228_v18 = vrot.slane %v23_v0, %v1612_v15  ;;  %v235_v19 = vrot.slane %v221_v9, %v1612_v15  ;;  %v53_v20 = vrot.slane %v15_v2, %v1612_v15  ;;  %v60_v21 = vrot.slane %v46_v10, %v1612_v15  ;;  %v18_v27 = vld [vmem:[%s1682_s0 + $0x18] sm:$0xff]  ;;  %v19_v42 = vld [vmem:[%s1682_s0 + $0x20] sm:$0xff]  ;;  %v28_v46 = vld [vmem:[%s1683_s1 + $0x28] sm:$0xff] }
   0x8   :  { %v245_v23 = vrot.slane %v24_v5, %v1612_v15  ;;  %v252_v24 = vrot.slane %v238_v13, %v1612_v15  ;;  %v70_v25 = vrot.slane %v16_v6, %v1612_v15  ;;  %v77_v26 = vrot.slane %v63_v14, %v1612_v15  ;;  %v20_v54 = vld [vmem:[%s1682_s0 + $0x28] sm:$0xff]  ;;  %v29_v58 = vld [vmem:[%s1683_s1 + $0x30] sm:$0xff]  ;;  %v30_v6 = vld [vmem:[%s1683_s1 + $0x38] sm:$0xff] }
   0x9   :  { %v236_v28 = vcombine.high %v228_v18, %v228_v18  ;;  %v237_v29 = vcombine.high %v235_v19, %v235_v19  ;;  %v61_v30 = vcombine.high %v53_v20, %v53_v20  ;;  %v62_v31 = vcombine.high %v60_v21, %v60_v21  ;;  %v21_v2 = vld [vmem:[%s1682_s0 + $0x30] sm:$0xff] }
   0xa   :  { %v253_v33 = vcombine.high %v245_v23, %v245_v23  ;;  %v254_v34 = vcombine.high %v252_v24, %v252_v24  ;;  %v272_v35 = vcombine.high %v26_v22, %v26_v22  ;;  %v262_v36 = vrot.slane %v25_v11, %v1612_v15 }
   0xb   :  { %423 = vmatprep.subr.mxu0 %v236_v28  ;;  %493 = vmatprep.subr.mxu1 %v237_v29  ;;  %v269_v37 = vrot.slane %v255_v16, %v1612_v15  ;;  %v97_v38 = vcombine.high %v18_v27, %v18_v27  ;;  %v87_v39 = vrot.slane %v17_v12, %v1612_v15 }
   0xc   :  { %424 = vmatpush1.xpose.msra.mxu0 %v228_v18  ;;  %494 = vmatpush1.xpose.msra.mxu1 %v235_v19  ;;  %v94_v40 = vrot.slane %v80_v17, %v1612_v15  ;;  %v289_v41 = vcombine.high %v27_v32, %v27_v32  ;;  %v78_v43 = vcombine.high %v70_v25, %v70_v25  ;;  %v22_v18 = vld [vmem:[%s1682_s0 + $0x38] sm:$0xff] }
   0xd   :  { %457 = vmatprep.mubr.f32.mxu0 %v61_v30  ;;  %527 = vmatprep.mubr.f32.mxu1 %v62_v31  ;;  %v79_v44 = vcombine.high %v77_v26, %v77_v26  ;;  %v279_v45 = vrot.slane %v26_v22, %v1612_v15  ;;  %v270_v47 = vcombine.high %v262_v36, %v262_v36 }
   0xe   :  { %563 = vmatprep.subr.mxu0 %v253_v33  ;;  %633 = vmatprep.subr.mxu1 %v254_v34  ;;  %v271_v48 = vcombine.high %v269_v37, %v269_v37  ;;  %v286_v49 = vrot.slane %v272_v35, %v1612_v15  ;;  %v114_v50 = vcombine.high %v19_v42, %v19_v42 }
   0xf   :  { %458 = vmatmul.mubr.f32.vlgmr.msra.gmra.mxu0 %v53_v20  ;;  %528 = vmatmul.mubr.f32.vlgmr.msra.gmra.mxu1 %v60_v21  ;;  %v95_v51 = vcombine.high %v87_v39, %v87_v39  ;;  %v96_v52 = vcombine.high %v94_v40, %v94_v40  ;;  %v306_v53 = vcombine.high %v28_v46, %v28_v46 }
  0x10   :  { %564 = vmatpush1.xpose.msra.mxu0 %v245_v23  ;;  %634 = vmatpush1.xpose.msra.mxu1 %v252_v24  ;;  %v104_v55 = vrot.slane %v18_v27, %v1612_v15  ;;  %v111_v56 = vrot.slane %v97_v38, %v1612_v15  ;;  %v296_v57 = vrot.slane %v27_v32, %v1612_v15 }
  0x11   :  { %597 = vmatprep.mubr.f32.mxu0 %v78_v43  ;;  %667 = vmatprep.mubr.f32.mxu1 %v79_v44  ;;  %v287_v59 = vcombine.high %v279_v45, %v279_v45  ;;  %v288_v60 = vcombine.high %v286_v49, %v286_v49  ;;  %v303_v61 = vrot.slane %v289_v41, %v1612_v15 }
  0x12   :  { %703 = vmatprep.subr.mxu0 %v270_v47  ;;  %773 = vmatprep.subr.mxu1 %v271_v48  ;;  %v131_v62 = vcombine.high %v20_v54, %v20_v54  ;;  %v121_v63 = vrot.slane %v19_v42, %v1612_v15  ;;  %v128_v0 = vrot.slane %v114_v50, %v1612_v15 }
  0x13   :  { %598 = vmatmul.mubr.f32.vlgmr.msra.gmra.mxu0 %v70_v25  ;;  %668 = vmatmul.mubr.f32.vlgmr.msra.gmra.mxu1 %v77_v26  ;;  %v323_v1 = vcombine.high %v29_v58, %v29_v58  ;;  %v112_v3 = vcombine.high %v104_v55, %v104_v55  ;;  %v113_v4 = vcombine.high %v111_v56, %v111_v56 }
  0x14   :  { %704 = vmatpush1.xpose.msra.mxu0 %v262_v36  ;;  %774 = vmatpush1.xpose.msra.mxu1 %v269_v37  ;;  %v304_v5 = vcombine.high %v296_v57, %v296_v57  ;;  %v305_v7 = vcombine.high %v303_v61, %v303_v61  ;;  %v313_v8 = vrot.slane %v28_v46, %v1612_v15 }
  0x15   :  { %737 = vmatprep.mubr.f32.mxu0 %v95_v51  ;;  %807 = vmatprep.mubr.f32.mxu1 %v96_v52  ;;  %v320_v9 = vrot.slane %v306_v53, %v1612_v15  ;;  %v148_v10 = vcombine.high %v21_v2, %v21_v2  ;;  %v138_v11 = vrot.slane %v20_v54, %v1612_v15 }
  0x16   :  { %843 = vmatprep.subr.mxu0 %v287_v59  ;;  %913 = vmatprep.subr.mxu1 %v288_v60  ;;  %v145_v12 = vrot.slane %v131_v62, %v1612_v15  ;;  %v340_v13 = vcombine.high %v30_v6, %v30_v6  ;;  %v129_v14 = vcombine.high %v121_v63, %v121_v63 }
  0x17   :  { %738 = vmatmul.mubr.f32.vlgmr.msra.gmra.mxu0 %v87_v39  ;;  %808 = vmatmul.mubr.f32.vlgmr.msra.gmra.mxu1 %v94_v40  ;;  %v130_v16 = vcombine.high %v128_v0, %v128_v0  ;;  %v330_v17 = vrot.slane %v29_v58, %v1612_v15  ;;  %v321_v19 = vcombine.high %v313_v8, %v313_v8 }
  0x18   :  { %844 = vmatpush1.xpose.msra.mxu0 %v279_v45  ;;  %914 = vmatpush1.xpose.msra.mxu1 %v286_v49  ;;  %v322_v20 = vcombine.high %v320_v9, %v320_v9  ;;  %v337_v21 = vrot.slane %v323_v1, %v1612_v15  ;;  %v146_v22 = vcombine.high %v138_v11, %v138_v11 }
  0x19   :  { %877 = vmatprep.mubr.f32.mxu0 %v112_v3  ;;  %947 = vmatprep.mubr.f32.mxu1 %v113_v4  ;;  %v147_v23 = vcombine.high %v145_v12, %v145_v12  ;;  %v165_v24 = vcombine.high %v22_v18, %v22_v18  ;;  %v338_v25 = vcombine.high %v330_v17, %v330_v17 }
  0x1a   :  { %983 = vmatprep.subr.mxu0 %v304_v5  ;;  %1053 = vmatprep.subr.mxu1 %v305_v7  ;;  %v155_v26 = vrot.slane %v21_v2, %v1612_v15  ;;  %v162_v27 = vrot.slane %v148_v10, %v1612_v15  ;;  %v339_v28 = vcombine.high %v337_v21, %v337_v21 }
  0x1b   :  { %878 = vmatmul.mubr.f32.vlgmr.msra.gmra.mxu0 %v104_v55  ;;  %948 = vmatmul.mubr.f32.vlgmr.msra.gmra.mxu1 %v111_v56  ;;  %v347_v29 = vrot.slane %v30_v6, %v1612_v15  ;;  %v354_v30 = vrot.slane %v340_v13, %v1612_v15  ;;  %v172_v31 = vrot.slane %v22_v18, %v1612_v15 }
  0x1c   :  { %984 = vmatpush1.xpose.msra.mxu0 %v296_v57  ;;  %1054 = vmatpush1.xpose.msra.mxu1 %v303_v61  ;;  %v163_v32 = vcombine.high %v155_v26, %v155_v26  ;;  %v164_v33 = vcombine.high %v162_v27, %v162_v27  ;;  %v179_v34 = vrot.slane %v165_v24, %v1612_v15  ;;  %v1529_v15 = vld [vmem:[%s1684_s2] ss:$0 sm:$0xff]  ;;  %s1573_s2 = smov [#allocation2]  }
  0x1d   :  { %1017 = vmatprep.mubr.f32.mxu0 %v129_v14  ;;  %1087 = vmatprep.mubr.f32.mxu1 %v130_v16  ;;  %v355_v35 = vcombine.high %v347_v29, %v347_v29  ;;  %v356_v36 = vcombine.high %v354_v30, %v354_v30  ;;  %v180_v37 = vcombine.high %v172_v31, %v172_v31  ;;  %s1521_s17 = sshll.u32 %s1573_s2, 4  ;;  %s1522_s17 = int_to_ptr.vmem [resolvable:$true] %s1521_s17 }
  0x1e   :  { %1123 = vmatprep.subr.mxu0 %v321_v19  ;;  %1193 = vmatprep.subr.mxu1 %v322_v20  ;;  %v181_v38 = vcombine.high %v179_v34, %v179_v34  ;;  %s1550_s18 = scalar_lea.vmem %s1522_s17, 32  ;;  %p1555_p1 = scmp.lt.s32.totalorder %s1522_s17, %s1522_s17 }
  0x1f   :  { %1018 = vmatmul.mubr.f32.vlgmr.msra.gmra.mxu0 %v121_v63  ;;  %1088 = vmatmul.mubr.f32.vlgmr.msra.gmra.mxu1 %v128_v0  ;;  %p1551_p0 = scmp.ne.s32.totalorder %s1522_s17, %s1550_s18  ;;  %p1556_p2 = scmp.lt.s32.totalorder %s1550_s18, %s1550_s18 }
  0x20   :  { %1124 = vmatpush1.xpose.msra.mxu0 %v313_v8  ;;  %1194 = vmatpush1.xpose.msra.mxu1 %v320_v9 }
  0x21   :  { %1157 = vmatprep.mubr.f32.mxu0 %v146_v22  ;;  %1227 = vmatprep.mubr.f32.mxu1 %v147_v23  ;;  %p1557_p3 = por %p1556_p2, %p1555_p1 }
  0x22   :  { %1263 = vmatprep.subr.mxu0 %v338_v25  ;;  %1333 = vmatprep.subr.mxu1 %v339_v28 }
  0x23   :  { %1158 = vmatmul.mubr.f32.vlgmr.msra.gmra.mxu0 %v138_v11  ;;  %1228 = vmatmul.mubr.f32.vlgmr.msra.gmra.mxu1 %v145_v12  ;;  %p1558_p4 = pnand %p1557_p3, %p1551_p0 }
  0x24   :  { %1264 = vmatpush1.xpose.msra.mxu0 %v330_v17  ;;  %1334 = vmatpush1.xpose.msra.mxu1 %v337_v21 }
  0x25   :  { %1297 = vmatprep.mubr.f32.mxu0 %v163_v32  ;;  %1367 = vmatprep.mubr.f32.mxu1 %v164_v33 }
  0x26   :  { %1403 = vmatprep.subr.mxu0 %v355_v35  ;;  %1530 = vmatprep.subr.msk.mxu1 %vm388_vm0, %v356_v36 }
  0x27   :  { %1298 = vmatmul.mubr.f32.vlgmr.msra.gmra.mxu0 %v155_v26  ;;  %1368 = vmatmul.mubr.f32.vlgmr.msra.gmra.mxu1 %v162_v27 }
  0x28   :  { %1404 = vmatpush1.xpose.msra.mxu0 %v347_v29  ;;  %1474 = vmatpush1.xpose.msra.mxu1 %v354_v30 }
  0x29   :  { %1437 = vmatprep.mubr.f32.mxu0 %v180_v37  ;;  %1531 = vmatprep.mubr.msk.f32.mxu1 %vm388_vm0, %v181_v38 }
  0x2b   :  { %1438 = vmatmul.mubr.f32.vlgmr.msra.gmra.mxu0 %v172_v31  ;;  %1508 = vmatmul.mubr.f32.vlgmr.msra.gmra.mxu1 %v179_v34 }
  0xcf   :  { %v459_v39 = vpop.f32.mrf.mxu0  ;;  %v529_v40 = vpop.f32.mrf.mxu1 }
  0xd0   :  { %v460_v41 = vadd.f32 %v1529_v15, %v459_v39 }
  0xd1   :  { %v461_v42 = vpop.f32.mrf.mxu0  ;;  %v531_v43 = vpop.f32.mrf.mxu1 }
  0xd2   :  { %v530_v44 = vadd.f32 %v529_v40, %v460_v41 }
  0xd3   :  { %v599_v45 = vpop.f32.mrf.mxu0  ;;  %v669_v46 = vpop.f32.mrf.mxu1 }
  0xd4   :  { %v600_v47 = vadd.f32 %v599_v45, %v530_v44 }
  0xd5   :  { %v601_v48 = vpop.f32.mrf.mxu0  ;;  %v671_v49 = vpop.f32.mrf.mxu1 }
  0xd6   :  { %v670_v50 = vadd.f32 %v669_v46, %v600_v47 }
  0xd7   :  { %v739_v51 = vpop.f32.mrf.mxu0  ;;  %v809_v52 = vpop.f32.mrf.mxu1 }
  0xd8   :  { %v740_v53 = vadd.f32 %v739_v51, %v670_v50 }
  0xd9   :  { %v741_v54 = vpop.f32.mrf.mxu0  ;;  %v811_v55 = vpop.f32.mrf.mxu1 }
  0xda   :  { %v810_v56 = vadd.f32 %v809_v52, %v740_v53 }
  0xdb   :  { %v879_v57 = vpop.f32.mrf.mxu0  ;;  %v949_v58 = vpop.f32.mrf.mxu1 }
  0xdc   :  { %v880_v59 = vadd.f32 %v879_v57, %v810_v56 }
  0xdd   :  { %v881_v60 = vpop.f32.mrf.mxu0  ;;  %v951_v61 = vpop.f32.mrf.mxu1 }
  0xde   :  { %v950_v62 = vadd.f32 %v949_v58, %v880_v59 }
  0xdf   :  { %v1019_v63 = vpop.f32.mrf.mxu0  ;;  %v1089_v0 = vpop.f32.mrf.mxu1 }
  0xe0   :  { %v1020_v1 = vadd.f32 %v1019_v63, %v950_v62 }
  0xe1   :  { %v1021_v2 = vpop.f32.mrf.mxu0  ;;  %v1091_v3 = vpop.f32.mrf.mxu1 }
  0xe2   :  { %v1090_v4 = vadd.f32 %v1089_v0, %v1020_v1 }
  0xe3   :  { %v1159_v5 = vpop.f32.mrf.mxu0  ;;  %v1229_v6 = vpop.f32.mrf.mxu1 }
  0xe4   :  { %v1160_v7 = vadd.f32 %v1159_v5, %v1090_v4 }
  0xe5   :  { %v1161_v8 = vpop.f32.mrf.mxu0  ;;  %v1231_v9 = vpop.f32.mrf.mxu1 }
  0xe6   :  { %v1230_v10 = vadd.f32 %v1229_v6, %v1160_v7 }
  0xe7   :  { %v1299_v11 = vpop.f32.mrf.mxu0  ;;  %v1369_v12 = vpop.f32.mrf.mxu1 }
  0xe8   :  { %v1300_v13 = vadd.f32 %v1299_v11, %v1230_v10 }
  0xe9   :  { %v1301_v14 = vpop.f32.mrf.mxu0  ;;  %v1371_v16 = vpop.f32.mrf.mxu1 }
  0xea   :  { %v1370_v17 = vadd.f32 %v1369_v12, %v1300_v13 }
  0xeb   :  { %v1439_v18 = vpop.f32.mrf.mxu0  ;;  %v1509_v19 = vpop.f32.mrf.mxu1 }
  0xec   :  { %v1440_v20 = vadd.f32 %v1439_v18, %v1370_v17 }
  0xed   :  { %v1441_v21 = vpop.f32.mrf.mxu0  ;;  %v1511_v22 = vpop.f32.mrf.mxu1 }
  0xee   :  { %v1510_v23 = vadd.f32 %v1509_v19, %v1440_v20 }
  0xf0   :  { %1514 = vst.msk [vmem:[#allocation2] sm:$0x3] %vm1513_vm1, %v1510_v23 }
  0xf1   :  { %1561 = shalt.err (!%p1558_p4)
}
  0xf2   :  { %1524 = dma.vmem_to_hbm [thread:$0]  %s1522_s17, 32, %s1685_s3, [#allocation3]  }
  0xf3   :  { %1570 = dma.done.wait [#allocation3], 32  }
  0xf4   :  { %1571 = vsyncadd [#allocation3], 4294967264 }
  0xf5   :  { %1528 = vsyncpa [#allocation3], 1 }

</bundles_post_ra>
